<compile_context>
chip_gen: v5e
topology: v5e:2x2
jax: 0.10.0
libtpu: 0.0.40
codegen_flags: <defaults>
</compile_context>

<pallas_src>
import functools

import jax
import jax.numpy as jnp
from jax.experimental import pallas as pl
from jax.experimental.pallas import tpu as pltpu


def _triplet_kernel(a_ref, p_ref, n_ref, o_ref, acc_ref, *,
                    margin, batch_size, tile_rows, tiles_per_split):
    """One (tile_rows, D) batch tile; accumulates the hinge-loss sum per split."""
    c = pl.program_id(0)   # TensorCore split (parallel)
    i = pl.program_id(1)   # batch-tile index within the split (reduction)

    @pl.when(i == 0)
    def _():
        acc_ref[...] = jnp.zeros_like(acc_ref)

    a = a_ref[...].astype(jnp.float32)
    p = p_ref[...].astype(jnp.float32)
    n = n_ref[...].astype(jnp.float32)

    ss_a = jnp.sum(a * a, axis=-1, keepdims=True)        # (tb, 1)
    ss_p = jnp.sum(p * p, axis=-1, keepdims=True)
    ss_n = jnp.sum(n * n, axis=-1, keepdims=True)
    dot_ap = jnp.sum(a * p, axis=-1, keepdims=True)
    dot_an = jnp.sum(a * n, axis=-1, keepdims=True)

    # max(||a||*||b||, eps) == sqrt(max(ss_a*ss_b, eps^2))  ->  rsqrt of the clamp.
    eps2 = jnp.float32(1e-8 * 1e-8)
    pos_sim = dot_ap * jax.lax.rsqrt(jnp.maximum(ss_a * ss_p, eps2))
    neg_sim = dot_an * jax.lax.rsqrt(jnp.maximum(ss_a * ss_n, eps2))

    # (1 - pos_sim) - (1 - neg_sim) + margin  ==  neg_sim - pos_sim + margin
    row_loss = jnp.maximum(neg_sim - pos_sim + jnp.float32(margin),
                           jnp.float32(0.0))              # (tb, 1)

    # Mask rows that are zero-padding beyond the real batch.
    row0 = (c * tiles_per_split + i) * tile_rows
    row_ids = jax.lax.broadcasted_iota(jnp.int32, row_loss.shape, 0) + row0
    row_loss = jnp.where(row_ids < batch_size, row_loss, jnp.float32(0.0))

    acc_ref[...] += jnp.sum(row_loss, axis=0, keepdims=True)   # (1, 1) accumulator

    @pl.when(i == pl.num_programs(1) - 1)
    def _():
        o_ref[...] = (acc_ref[...] * jnp.float32(1.0 / batch_size)).reshape(1, 1, 1)


def cosine_triplet_loss(anchors, positives, negatives, margin=0.1,
                        tb=1024, num_splits=2):
    """Pallas implementation of CosineTripletLoss.forward. Returns scalar float32."""
    B, D = anchors.shape
    assert positives.shape == (B, D) and negatives.shape == (B, D)

    itemsize = jnp.dtype(anchors.dtype).itemsize
    sublane = {4: 8, 2: 16, 1: 32}.get(itemsize, 8)

    def round_up(x, m):
        return ((x + m - 1) // m) * m

    # Pick the batch tile: as large as requested, but no larger than needed for
    # this batch-per-split, and small enough that 3 inputs x 2 pipeline buffers
    # stay well inside v7x's 64 MiB physical VMEM (~24 MiB working-set budget).
    tb_eff = min(int(tb), round_up(pl.cdiv(B, num_splits), sublane))
    tb_eff = max(round_up(tb_eff, sublane), sublane)
    while tb_eff > sublane and 6 * tb_eff * D * itemsize > (24 << 20):
        tb_eff = max(round_up(tb_eff // 2, sublane), sublane)

    # Drop empty splits (e.g. the whole batch fits in one tile).
    n_tiles = pl.cdiv(B, tb_eff)
    splits_eff = max(1, min(int(num_splits), n_tiles))
    tiles_per_split = pl.cdiv(n_tiles, splits_eff)
    b_padded = splits_eff * tiles_per_split * tb_eff
    if b_padded != B:                       # ragged batch: pad with zeros, mask in-kernel
        pad = ((0, b_padded - B), (0, 0))
        anchors = jnp.pad(anchors, pad)
        positives = jnp.pad(positives, pad)
        negatives = jnp.pad(negatives, pad)

    kernel = functools.partial(
        _triplet_kernel,
        margin=float(margin),
        batch_size=int(B),
        tile_rows=int(tb_eff),
        tiles_per_split=int(tiles_per_split),
    )

    in_map = lambda c, i: (c * tiles_per_split + i, 0)
    vmem_limit = int(max(6 * tb_eff * D * itemsize + (4 << 20), 16 << 20))

    partials = pl.pallas_call(
        kernel,
        out_shape=jax.ShapeDtypeStruct((splits_eff, 1, 1), jnp.float32),
        grid_spec=pltpu.PrefetchScalarGridSpec(
            num_scalar_prefetch=0,
            grid=(splits_eff, tiles_per_split),
            in_specs=[
                pl.BlockSpec((tb_eff, D), in_map),  # anchors
                pl.BlockSpec((tb_eff, D), in_map),  # positives
                pl.BlockSpec((tb_eff, D), in_map),  # negatives
            ],
            out_specs=pl.BlockSpec((1, 1, 1), lambda c, i: (c, 0, 0)),
            scratch_shapes=[pltpu.VMEM((1, 1), jnp.float32)],
        ),
        compiler_params=pltpu.CompilerParams(
            # batch split across TensorCores (v7x); reduction axis stays serial.
            dimension_semantics=("parallel", "arbitrary"),
            vmem_limit_bytes=vmem_limit,
        ),
    )(anchors, positives, negatives)
    return jnp.sum(partials)


def _reference(anchors, positives, negatives, margin=0.1):
    eps = 1e-8
    a = anchors.astype(jnp.float32)
    p = positives.astype(jnp.float32)
    n = negatives.astype(jnp.float32)

    def cos(x, y):
        num = jnp.sum(x * y, axis=-1)
        den = jnp.maximum(jnp.linalg.norm(x, axis=-1) * jnp.linalg.norm(y, axis=-1), eps)
        return num / den

    pos_d = 1.0 - cos(a, p)
    neg_d = 1.0 - cos(a, n)
    return jnp.mean(jnp.maximum(pos_d - neg_d + margin, 0.0))


if __name__ == "__main__":
    key = jax.random.PRNGKey(0)

    # Case 1: small f32, divides evenly (single tile, split axis collapses to 1).
    B, D = 8, 128
    ka, kp, kn = jax.random.split(key, 3)
    a = jax.random.normal(ka, (B, D), dtype=jnp.float32)
    p = jax.random.normal(kp, (B, D), dtype=jnp.float32)
    n = jax.random.normal(kn, (B, D), dtype=jnp.float32)
    loss = jax.block_until_ready(cosine_triplet_loss(a, p, n, margin=0.1))
    ref = _reference(a, p, n, margin=0.1)
    assert jnp.allclose(loss, ref, atol=1e-5, rtol=1e-5), (loss, ref)

    # Case 2: ragged batch (exercises padding + in-kernel row mask).
    B, D = 10, 256
    ka, kp, kn = jax.random.split(jax.random.PRNGKey(1), 3)
    a = jax.random.normal(ka, (B, D), dtype=jnp.float32)
    p = jax.random.normal(kp, (B, D), dtype=jnp.float32)
    n = jax.random.normal(kn, (B, D), dtype=jnp.float32)
    loss = jax.block_until_ready(cosine_triplet_loss(a, p, n, margin=0.2))
    ref = _reference(a, p, n, margin=0.2)
    assert jnp.allclose(loss, ref, atol=1e-5, rtol=1e-5), (loss, ref)

    # Case 3: bf16 inputs read natively (f32 math inside the kernel).
    B, D = 64, 128
    ka, kp, kn = jax.random.split(jax.random.PRNGKey(2), 3)
    a = jax.random.normal(ka, (B, D), dtype=jnp.float32).astype(jnp.bfloat16)
    p = jax.random.normal(kp, (B, D), dtype=jnp.float32).astype(jnp.bfloat16)
    n = jax.random.normal(kn, (B, D), dtype=jnp.float32).astype(jnp.bfloat16)
    loss = jax.block_until_ready(cosine_triplet_loss(a, p, n, margin=0.1))
    ref = _reference(a, p, n, margin=0.1)
    assert jnp.allclose(loss, ref, atol=1e-4, rtol=1e-4), (loss, ref)

    # Case 4: larger batch exercising multiple tiles per split + both splits.
    B, D = 4096, 128
    ka, kp, kn = jax.random.split(jax.random.PRNGKey(3), 3)
    a = jax.random.normal(ka, (B, D), dtype=jnp.float32)
    p = jax.random.normal(kp, (B, D), dtype=jnp.float32)
    n = jax.random.normal(kn, (B, D), dtype=jnp.float32)
    loss = jax.block_until_ready(cosine_triplet_loss(a, p, n, margin=0.1, tb=512))
    ref = _reference(a, p, n, margin=0.1)
    assert jnp.allclose(loss, ref, atol=1e-5, rtol=1e-5), (loss, ref)

    print("KERNEL_OK")
</pallas_src>

<mosaic_0001>
module attributes {stable_mosaic.version = 11 : i64} {
  func.func @_triplet_kernel(%arg0: i32, %arg1: i32, %arg2: memref<8x128xf32, #tpu.memory_space<vmem>>, %arg3: memref<8x128xf32, #tpu.memory_space<vmem>>, %arg4: memref<8x128xf32, #tpu.memory_space<vmem>>, %arg5: memref<1x1x1xf32, #tpu.memory_space<vmem>>, %arg6: memref<1x1xf32, #tpu.memory_space<vmem>>) attributes {dimension_semantics = [#tpu.dimension_semantics<parallel>, #tpu.dimension_semantics<arbitrary>], iteration_bounds = array<i64: 1, 1>, scalar_prefetch = 0 : i64, scratch_operands = 1 : i64, tpu.core_type = #tpu.core_type<tc>, window_params = [{transform_indices = @transform_0, window_bounds = array<i64: 8, 128>}, {transform_indices = @transform_1, window_bounds = array<i64: 8, 128>}, {transform_indices = @transform_2, window_bounds = array<i64: 8, 128>}, {transform_indices = @transform_3, window_bounds = array<i64: 1, 1, 1>}]} {
    %c0_i32 = arith.constant 0 : i32
    %0 = arith.cmpi eq, %arg1, %c0_i32 : i32
    %1 = arith.extui %0 : i1 to i32
    %c0_i32_0 = arith.constant 0 : i32
    %2 = arith.cmpi ne, %1, %c0_i32_0 : i32
    scf.if %2 {
      %cst_23 = arith.constant 0.000000e+00 : f32
      %54 = vector.broadcast %cst_23 : f32 to vector<1x1xf32>
      %c0_24 = arith.constant 0 : index
      %c0_25 = arith.constant 0 : index
      %55 = vector.load %arg6[%c0_24, %c0_25] : memref<1x1xf32, #tpu.memory_space<vmem>>, vector<1x1xf32>
      tpu.vector_store %arg6[%c0_24, %c0_25], %54 {strides = array<i32>} : memref<1x1xf32, #tpu.memory_space<vmem>>, vector<1x1xf32>,
    } else {
    }
    %c0 = arith.constant 0 : index
    %c0_1 = arith.constant 0 : index
    %3 = vector.load %arg2[%c0, %c0_1] : memref<8x128xf32, #tpu.memory_space<vmem>>, vector<8x128xf32>
    %c0_2 = arith.constant 0 : index
    %c0_3 = arith.constant 0 : index
    %4 = vector.load %arg3[%c0_2, %c0_3] : memref<8x128xf32, #tpu.memory_space<vmem>>, vector<8x128xf32>
    %c0_4 = arith.constant 0 : index
    %c0_5 = arith.constant 0 : index
    %5 = vector.load %arg4[%c0_4, %c0_5] : memref<8x128xf32, #tpu.memory_space<vmem>>, vector<8x128xf32>
    %6 = arith.mulf %3, %3 : vector<8x128xf32>
    %cst = arith.constant dense<0.000000e+00> : vector<8xf32>
    %7 = vector.multi_reduction <add>, %6, %cst [1] : vector<8x128xf32> to vector<8xf32>
    %8 = vector.shape_cast %7 : vector<8xf32> to vector<8x1xf32>
    %9 = arith.mulf %4, %4 : vector<8x128xf32>
    %cst_6 = arith.constant dense<0.000000e+00> : vector<8xf32>
    %10 = vector.multi_reduction <add>, %9, %cst_6 [1] : vector<8x128xf32> to vector<8xf32>
    %11 = vector.shape_cast %10 : vector<8xf32> to vector<8x1xf32>
    %12 = arith.mulf %5, %5 : vector<8x128xf32>
    %cst_7 = arith.constant dense<0.000000e+00> : vector<8xf32>
    %13 = vector.multi_reduction <add>, %12, %cst_7 [1] : vector<8x128xf32> to vector<8xf32>
    %14 = vector.shape_cast %13 : vector<8xf32> to vector<8x1xf32>
    %15 = arith.mulf %3, %4 : vector<8x128xf32>
    %cst_8 = arith.constant dense<0.000000e+00> : vector<8xf32>
    %16 = vector.multi_reduction <add>, %15, %cst_8 [1] : vector<8x128xf32> to vector<8xf32>
    %17 = vector.shape_cast %16 : vector<8xf32> to vector<8x1xf32>
    %18 = arith.mulf %3, %5 : vector<8x128xf32>
    %cst_9 = arith.constant dense<0.000000e+00> : vector<8xf32>
    %19 = vector.multi_reduction <add>, %18, %cst_9 [1] : vector<8x128xf32> to vector<8xf32>
    %20 = vector.shape_cast %19 : vector<8xf32> to vector<8x1xf32>
    %21 = arith.mulf %8, %11 : vector<8x1xf32>
    %cst_10 = arith.constant 1.000000e-16 : f32
    %22 = vector.broadcast %cst_10 : f32 to vector<8x1xf32>
    %23 = arith.maximumf %21, %22 : vector<8x1xf32>
    %24 = math.rsqrt %23 : vector<8x1xf32>
    %25 = arith.mulf %17, %24 : vector<8x1xf32>
    %26 = arith.mulf %8, %14 : vector<8x1xf32>
    %cst_11 = arith.constant 1.000000e-16 : f32
    %27 = vector.broadcast %cst_11 : f32 to vector<8x1xf32>
    %28 = arith.maximumf %26, %27 : vector<8x1xf32>
    %29 = math.rsqrt %28 : vector<8x1xf32>
    %30 = arith.mulf %20, %29 : vector<8x1xf32>
    %31 = arith.subf %30, %25 : vector<8x1xf32>
    %cst_12 = arith.constant 1.000000e-01 : f32
    %32 = vector.broadcast %cst_12 : f32 to vector<8x1xf32>
    %33 = arith.addf %31, %32 : vector<8x1xf32>
    %cst_13 = arith.constant 0.000000e+00 : f32
    %34 = vector.broadcast %cst_13 : f32 to vector<8x1xf32>
    %35 = arith.maximumf %33, %34 : vector<8x1xf32>
    %c1_i32 = arith.constant 1 : i32
    %36 = arith.muli %arg0, %c1_i32 : i32
    %37 = arith.addi %36, %arg1 : i32
    %c8_i32 = arith.constant 8 : i32
    %38 = arith.muli %37, %c8_i32 : i32
    %39 = tpu.iota {dimensions = array<i32: 0>} : vector<8x1xi32>
    %40 = vector.broadcast %38 : i32 to vector<8x1xi32>
    %41 = arith.addi %39, %40 : vector<8x1xi32>
    %c8_i32_14 = arith.constant 8 : i32
    %42 = vector.broadcast %c8_i32_14 : i32 to vector<8x1xi32>
    %43 = arith.cmpi slt, %41, %42 : vector<8x1xi32>
    %cst_15 = arith.constant 0.000000e+00 : f32
    %44 = vector.broadcast %cst_15 : f32 to vector<8x1xf32>
    %45 = arith.select %43, %35, %44 : vector<8x1xi1>, vector<8x1xf32>
    %c0_16 = arith.constant 0 : index
    %c0_17 = arith.constant 0 : index
    %46 = vector.load %arg6[%c0_16, %c0_17] : memref<1x1xf32, #tpu.memory_space<vmem>>, vector<1x1xf32>
    %cst_18 = arith.constant dense<0.000000e+00> : vector<1xf32>
    %47 = vector.multi_reduction <add>, %45, %cst_18 [0] : vector<8x1xf32> to vector<1xf32>
    %48 = vector.shape_cast %47 : vector<1xf32> to vector<1x1xf32>
    %49 = arith.addf %46, %48 : vector<1x1xf32>
    %c0_19 = arith.constant 0 : index
    %c0_20 = arith.constant 0 : index
    %50 = vector.load %arg6[%c0_19, %c0_20] : memref<1x1xf32, #tpu.memory_space<vmem>>, vector<1x1xf32>
    tpu.vector_store %arg6[%c0_19, %c0_20], %49 {strides = array<i32>} : memref<1x1xf32, #tpu.memory_space<vmem>>, vector<1x1xf32>,
    %c0_i32_21 = arith.constant 0 : i32
    %51 = arith.cmpi eq, %arg1, %c0_i32_21 : i32
    %52 = arith.extui %51 : i1 to i32
    %c0_i32_22 = arith.constant 0 : i32
    %53 = arith.cmpi ne, %52, %c0_i32_22 : i32
    scf.if %53 {
      %c0_23 = arith.constant 0 : index
      %c0_24 = arith.constant 0 : index
      %54 = vector.load %arg6[%c0_23, %c0_24] : memref<1x1xf32, #tpu.memory_space<vmem>>, vector<1x1xf32>
      %cst_25 = arith.constant 1.250000e-01 : f32
      %55 = vector.broadcast %cst_25 : f32 to vector<1x1xf32>
      %56 = arith.mulf %54, %55 : vector<1x1xf32>
      %57 = vector.shape_cast %56 : vector<1x1xf32> to vector<1x1x1xf32>
      %c0_26 = arith.constant 0 : index
      %c0_27 = arith.constant 0 : index
      %c0_28 = arith.constant 0 : index
      %58 = vector.load %arg5[%c0_26, %c0_27, %c0_28] : memref<1x1x1xf32, #tpu.memory_space<vmem>>, vector<1x1x1xf32>
      tpu.vector_store %arg5[%c0_26, %c0_27, %c0_28], %57 {strides = array<i32>} : memref<1x1x1xf32, #tpu.memory_space<vmem>>, vector<1x1x1xf32>,
    } else {
    }
    return
  }
  func.func @transform_0(%arg0: i32, %arg1: i32) -> (i32, i32) {
    %c1_i32 = arith.constant 1 : i32
    %0 = arith.muli %arg0, %c1_i32 : i32
    %1 = arith.addi %0, %arg1 : i32
    %c0_i32 = arith.constant 0 : i32
    %c0_i32_0 = arith.constant 0 : i32
    return %1, %c0_i32 : i32, i32
  }
  func.func @transform_1(%arg0: i32, %arg1: i32) -> (i32, i32) {
    %c1_i32 = arith.constant 1 : i32
    %0 = arith.muli %arg0, %c1_i32 : i32
    %1 = arith.addi %0, %arg1 : i32
    %c0_i32 = arith.constant 0 : i32
    %c0_i32_0 = arith.constant 0 : i32
    return %1, %c0_i32 : i32, i32
  }
  func.func @transform_2(%arg0: i32, %arg1: i32) -> (i32, i32) {
    %c1_i32 = arith.constant 1 : i32
    %0 = arith.muli %arg0, %c1_i32 : i32
    %1 = arith.addi %0, %arg1 : i32
    %c0_i32 = arith.constant 0 : i32
    %c0_i32_0 = arith.constant 0 : i32
    return %1, %c0_i32 : i32, i32
  }
  func.func @transform_3(%arg0: i32, %arg1: i32) -> (i32, i32, i32) {
    %c0_i32 = arith.constant 0 : i32
    %c0_i32_0 = arith.constant 0 : i32
    %c0_i32_1 = arith.constant 0 : i32
    return %arg0, %c0_i32, %c0_i32_0 : i32, i32, i32
  }
}

</mosaic_0001>

<bundles_post_ra>
// kernel: tpu_custom_call.1
= control target key start
LH: loop header
LB: loop body
LE: loop exit
PB: predicated region body
PF: predicated region fallthrough
CT: control target
= control target key end

     0   :  { %8 = vsyncpa [#allocation4], 0  ;;  %s314_s0 = inlined_call_operand.hbm [shape: f32[8,128], index: 0, kind: input, shape index: {}]   ;;  %s315_s1 = inlined_call_operand.hbm [shape: f32[8,128], index: 1, kind: input, shape index: {}]   ;;  %s316_s2 = inlined_call_operand.hbm [shape: f32[8,128], index: 2, kind: input, shape index: {}]   ;;  %s317_s3 = inlined_call_operand.hbm [shape: f32[1,1,1], index: 3, kind: output, shape index: {}]  }
   0x1   :  { %9 = vsyncpa [#allocation7], 0  ;;  %s33_s14 = sshll.u32 %s315_s1, 4  ;;  %s34_s14 = int_to_ptr.hbm [resolvable:$true] %s33_s14 }
   0x2   :  { %10 = vsyncpa [#allocation5], 0  ;;  %s274_s15 = smov [#allocation6]   ;;  %s19_s19 = sshll.u32 %s314_s0, 4  ;;  %s20_s19 = int_to_ptr.hbm [resolvable:$true] %s19_s19 }
   0x3   :  { %s35_s16 = sshll.u32 %s274_s15, 4  ;;  %s275_s20 = smov [#allocation3]   ;;  %s36_s16 = int_to_ptr.vmem [resolvable:$true] %s35_s16 }
   0x4   :  { %38 = dma.hbm_to_vmem [thread:$0]  %s34_s14, 128, %s36_s16, [#allocation7]  }
   0x5   :  { %s21_s21 = sshll.u32 %s275_s20, 4  ;;  %s47_s24 = sshll.u32 %s316_s2, 4  ;;  %s22_s21 = int_to_ptr.vmem [resolvable:$true] %s21_s21  ;;  %s48_s24 = int_to_ptr.hbm [resolvable:$true] %s47_s24 }
   0x6   :  { %24 = dma.hbm_to_vmem [thread:$0]  %s20_s19, 128, %s22_s21, [#allocation4]  }
   0x7   :  { %s276_s1 = smov [#allocation8]  }
   0x8   :  { %s49_s25 = sshll.u32 %s276_s1, 4  ;;  %s50_s25 = int_to_ptr.vmem [resolvable:$true] %s49_s25 }
   0x9   :  { %52 = dma.hbm_to_vmem [thread:$0]  %s48_s24, 128, %s50_s25, [#allocation7]  }
   0xa   :  { %268 = dma.done.wait [#allocation4], 128  }
   0xb   :  { %269 = vsyncadd [#allocation4], 4294967168 }
   0xc   :  { %270 = dma.done.wait [#allocation7], 256  }
   0xd   :  { %271 = vsyncadd [#allocation7], 4294967040  ;;  %v76_v0 = vld [vmem:[#allocation8] sm:$0xff]  ;;  %v74_v1 = vld [vmem:[#allocation3] sm:$0xff]  ;;  %vm72_vm0 = vcmask 0   ;;  %v277_v16 = vmov 0.0  }
   0xe   :  { %v83_v2 = vmul.f32 %v76_v0, %v76_v0  ;;  %v77_v3 = vmul.f32 %v74_v1, %v74_v1  ;;  %v89_v4 = vmul.f32 %v76_v0, %v74_v1  ;;  %v75_v5 = vld [vmem:[#allocation6] sm:$0xff]  ;;  %73 = vst.msk [vmem:[#allocation2] sm:$0x1] %vm72_vm0, %v277_v16  ;;  %s278_s0 = smov [#allocation9]   ;;  %s152_s28 = sshll.u32 %s317_s3, 4  ;;  %s153_s28 = int_to_ptr.hbm [resolvable:$true] %s152_s28 }
   0xf   :  { %v80_v6 = vmul.f32 %v75_v5, %v75_v5  ;;  %v86_v7 = vmul.f32 %v75_v5, %v74_v1  ;;  %s150_s2 = sshll.u32 %s278_s0, 4  ;;  %s151_s2 = int_to_ptr.vmem [resolvable:$true] %s150_s2 }
  0x10   :  { %84 = vadd.xlane.f32.xlu1 %v83_v2  ;;  %78 = vadd.xlane.f32.xlu0 %v77_v3 }
  0x11   :  { %90 = vadd.xlane.f32.xlu2 %v89_v4 }
  0x15   :  { %v129_v42 = vld [vmem:[#allocation2] sm:$0x1] }
  0x18   :  { %81 = vadd.xlane.f32.xlu0 %v80_v6  ;;  %87 = vadd.xlane.f32.xlu1 %v86_v7 }
  0x83   :  { %v85_v8 = vpop.xlane.xlu1 %84  ;;  %v79_v9 = vpop.xlane.xlu0 %78 }
  0x84   :  { %v105_v10 = vmul.f32 %v85_v8, %v79_v9  ;;  %v91_v27 = vpop.xlane.xlu2 %90 }
  0x86   :  { %v106_v11 = vmax.f32 %v105_v10, 1e-16 }
  0x88   :  { %168 = vrsqrt.f32 %v106_v11  ;;  %vm113_vm2 = vweird.f32 %v106_v11 }
  0x8b   :  { %v82_v12 = vpop.xlane.xlu0 %81  ;;  %v88_v29 = vpop.xlane.xlu1 %87 }
  0x8c   :  { %v92_v13 = vmul.f32 %v82_v12, %v79_v9 }
  0x8e   :  { %v169_v14 = vpop.eup %168  ;;  %v93_v15 = vmax.f32 %v92_v13, 1e-16 }
  0x8f   :  { %v108_v17 = vmul.f32 %v169_v14, %v106_v11  ;;  %vm114_vm1 = vweird.f32 %v169_v14 }
  0x90   :  { %170 = vrsqrt.f32 %v93_v15  ;;  %vm115_vm4 = vmor %vm113_vm2, %vm114_vm1  ;;  %vm100_vm5 = vweird.f32 %v93_v15 }
  0x91   :  { %v109_v18 = vmul.f32 %v169_v14, %v108_v17 }
  0x93   :  { %v110_v19 = vmul.f32 0.5, %v109_v18 }
  0x95   :  { %v111_v22 = vsub.f32 1.5, %v110_v19 }
  0x96   :  { %v171_v20 = vpop.eup %170 }
  0x97   :  { %v95_v21 = vmul.f32 %v171_v20, %v93_v15  ;;  %v112_v25 = vmul.f32 %v169_v14, %v111_v22  ;;  %vm101_vm3 = vweird.f32 %v171_v20 }
  0x98   :  { %vm102_vm6 = vmor %vm100_vm5, %vm101_vm3 }
  0x99   :  { %v96_v23 = vmul.f32 %v171_v20, %v95_v21  ;;  %v116_v28 = vsel %vm115_vm4, %v169_v14, %v112_v25 }
  0x9a   :  { %v117_v32 = vmul.f32 %v116_v28, %v91_v27 }
  0x9b   :  { %v97_v24 = vmul.f32 0.5, %v96_v23 }
  0x9d   :  { %v98_v26 = vsub.f32 1.5, %v97_v24 }
  0x9f   :  { %v99_v30 = vmul.f32 %v171_v20, %v98_v26 }
  0xa1   :  { %v103_v31 = vsel %vm102_vm6, %v171_v20, %v99_v30 }
  0xa2   :  { %v104_v33 = vmul.f32 %v103_v31, %v88_v29 }
  0xa4   :  { %v118_v34 = vsub.f32 %v117_v32, %v104_v33 }
  0xa6   :  { %v119_v35 = vadd.f32 0.1, %v118_v34 }
  0xa8   :  { %v120_v36 = vmax.f32 %v119_v35, 0.0 }
  0xaa   :  { %v130_v37 = vrot.slane %v120_v36, 4 }
  0xac   :  { %v131_v38 = vadd.f32 %v130_v37, %v120_v36 }
  0xae   :  { %v132_v39 = vrot.slane %v131_v38, 2 }
  0xb0   :  { %v133_v40 = vadd.f32 %v132_v39, %v131_v38 }
  0xb2   :  { %v134_v41 = vrot.slane %v133_v40, 1 }
  0xb4   :  { %v135_v43 = vadd.f32 %v134_v41, %v133_v40 }
  0xb6   :  { %v136_v44 = vadd.f32 %v135_v43, %v129_v42 }
  0xb8   :  { %138 = vst.msk [vmem:[#allocation2] sm:$0x1] %vm72_vm0, %v136_v44 }
  0xbf   :  { %v142_v45 = vld [vmem:[#allocation2] sm:$0x1] }
  0xc0   :  { %v143_v46 = vmul.f32 0.125, %v142_v45 }
  0xc2   :  { %144 = vst.msk [vmem:[#allocation9] sm:$0x1] %vm72_vm0, %v143_v46 }
  0xc3   :  { %155 = dma.vmem_to_hbm [thread:$0]  %s151_s2, 16, %s153_s28, [#allocation5]  }
  0xc4   :  { %272 = dma.done.wait [#allocation5], 16  }
  0xc5   :  { %273 = vsyncadd [#allocation5], 4294967280 }
  0xc6   :  { %160 = vsyncpa [#allocation4], 1 }
  0xc7   :  { %161 = vsyncpa [#allocation7], 1 }
  0xc8   :  { %162 = vsyncpa [#allocation5], 1 }

</bundles_post_ra>
